<compile_context>
chip_gen: v7x
topology: tpu7x:2x2x1
jax: 0.10.0
libtpu: 0.0.40
codegen_flags: <defaults>
</compile_context>

<pallas_src>
import jax
import jax.numpy as jnp
from jax.experimental import pallas as pl
from jax.experimental.pallas import tpu as pltpu

_LANE = 128
_SUBLANE = 8
_MIB = 1024 * 1024


def _round_up(x, m):
    return (x + m - 1) // m * m


def _vmem_capacity_bytes():
    try:
        cap = getattr(pltpu.get_tpu_info(), "vmem_capacity_bytes", None)
        if cap:
            return int(cap)
    except Exception:
        pass
    return 64 * _MIB  # conservative fallback (smallest across v5e/v6e/v7x)


def _gcn_kernel(a_ref, hw_ref, o_ref):
    # a_ref : (1, tm, N)    f32  -- row strip of A; cast to bf16 per tile here
    # hw_ref: (1, N, OUTP)  bf16 -- H @ W, lane-padded; resident per batch
    # o_ref : (1, tm, OUTP) f32
    a = a_ref[0].astype(jnp.bfloat16)                          # hidden under A DMA
    acc = jnp.dot(a, hw_ref[0], preferred_element_type=jnp.float32)
    o_ref[0] = jnp.maximum(acc, 0.0).astype(o_ref.dtype)       # ReLU in f32


def _choose_tm(n, out_pad, tile_budget):
    """Row-strip height under the per-tile VMEM budget."""
    fixed = 2 * n * out_pad * 2                      # HW resident, bf16, 2 bufs
    per_row = 2 * n * 4 + n * 2 + 2 * out_pad * 4    # A f32 x2 + bf16 temp + out f32 x2
    avail = max(tile_budget - fixed, 0)
    tm = int(min(avail // per_row, 512)) if per_row else n
    if tm >= n:
        return n                                     # single full strip per batch
    if tm >= _LANE:
        tm = (tm // _LANE) * _LANE                   # 128-granular (v5e MXU is 4x128x128)
    else:
        tm = max(_SUBLANE, (tm // _SUBLANE) * _SUBLANE)
    return tm


def gcn_layer(A, H, W, last=False):
    """Pallas implementation of GCNLayer.forward((A, H))."""
    B, N, _ = A.shape
    out_dim = W.shape[-1]
    out_pad = _round_up(out_dim, _LANE)

    # Reassociate: relu((A @ H) @ W) == relu(A @ (H @ W)).  HW is tiny next to
    # A, so computing it in XLA (f32 accumulate) and casting once to bf16 is
    # cheap and removes the dependent second matmul + intermediate cast.
    w_p = jnp.pad(W.astype(jnp.float32), ((0, 0), (0, out_pad - out_dim)))
    hw = jnp.einsum("bnd,do->bno", H.astype(jnp.float32), w_p).astype(jnp.bfloat16)

    cap = _vmem_capacity_bytes()
    if cap <= 64 * _MIB:              # v7x-class (64 MiB per TC)
        tile_budget, limit_cap = 20 * _MIB, 40 * _MIB
    else:                             # v5e / v6e (128 MiB)
        tile_budget, limit_cap = 48 * _MIB, 88 * _MIB

    tm = _choose_tm(N, out_pad, tile_budget)
    grid = (B, pl.cdiv(N, tm))

    vmem_need = (2 * tm * N * 4            # A strips (f32, double-buffered)
                 + tm * N * 2              # in-kernel bf16 copy of the strip
                 + 2 * N * out_pad * 2     # HW (bf16, double-buffered)
                 + 2 * tm * out_pad * 4)   # out strips (f32, double-buffered)
    vmem_limit = int(min(max(2 * vmem_need, 8 * _MIB), limit_cap))

    # TODO(synk): if xprof shows exposed A DMA at small tm (huge N), deepen the
    #             A pipeline with pipeline_mode=pl.Buffered(3) on the A spec.
    # TODO(synk): at toy sizes, multiple batch elements per grid step (batched
    #             einsum in-kernel) would amortize per-step overhead further.
    out_p = pl.pallas_call(
        _gcn_kernel,
        out_shape=jax.ShapeDtypeStruct((B, N, out_pad), jnp.float32),
        grid_spec=pltpu.PrefetchScalarGridSpec(
            num_scalar_prefetch=0,
            grid=grid,
            in_specs=[
                pl.BlockSpec((1, tm, N), lambda b, i: (b, i, 0)),        # A row strip
                pl.BlockSpec((1, N, out_pad), lambda b, i: (b, 0, 0)),   # HW, resident per b
            ],
            out_specs=pl.BlockSpec((1, tm, out_pad), lambda b, i: (b, i, 0)),
        ),
        compiler_params=pltpu.CompilerParams(
            dimension_semantics=("parallel", "parallel"),
            vmem_limit_bytes=vmem_limit,
        ),
    )(A.astype(jnp.float32), hw)

    # TODO(synk): for stacked GCN layers, keep the lane-padded (.., 128) slab
    #             flowing between layers and slice only after the last layer.
    out = out_p[:, :, :out_dim]
    if last:
        return out
    return (A, out)


if __name__ == "__main__":
    # Small deterministic example shapes consistent with the module.
    B, N, d, out_dim = 2, 16, 32, 64

    key = jax.random.PRNGKey(0)
    k_a, k_h, k_w = jax.random.split(key, 3)

    A = jax.random.normal(k_a, (B, N, N), dtype=jnp.float32)
    H = jax.random.normal(k_h, (B, N, d), dtype=jnp.float32)
    # Parameter W ~ torch.randn((d, 64)) — initialized deterministically here.
    W = jax.random.normal(k_w, (d, out_dim), dtype=jnp.float32)

    A_out, H_out = gcn_layer(A, H, W, last=False)
    jax.block_until_ready(H_out)

    # Reference in plain JAX (f32). Kernel uses bf16 MXU operands with f32
    # accumulation, so compare with a loosened tolerance.
    ref = jnp.maximum(jnp.einsum("bnm,bmd->bnd", A, H) @ W, 0.0)
    assert H_out.shape == ref.shape
    assert jnp.allclose(H_out, ref, atol=0.5, rtol=5e-2), \
        float(jnp.max(jnp.abs(H_out - ref)))
    assert A_out.shape == A.shape

    print("KERNEL_OK")
</pallas_src>

<mosaic_0001>
module attributes {stable_mosaic.version = 11 : i64} {
  func.func @_gcn_kernel(%arg0: i32, %arg1: i32, %arg2: memref<1x16x16xf32, #tpu.memory_space<vmem>>, %arg3: memref<1x16x128xbf16, #tpu.memory_space<vmem>>, %arg4: memref<1x16x128xf32, #tpu.memory_space<vmem>>) attributes {dimension_semantics = [#tpu.dimension_semantics<parallel>, #tpu.dimension_semantics<parallel>], iteration_bounds = array<i64: 2, 1>, scalar_prefetch = 0 : i64, scratch_operands = 0 : i64, tpu.core_type = #tpu.core_type<tc>, window_params = [{transform_indices = @transform_0, window_bounds = array<i64: 1, 16, 16>}, {transform_indices = @transform_1, window_bounds = array<i64: 1, 16, 128>}, {transform_indices = @transform_2, window_bounds = array<i64: 1, 16, 128>}]} {
    %c0 = arith.constant 0 : index
    %c0_0 = arith.constant 0 : index
    %c0_1 = arith.constant 0 : index
    %0 = vector.load %arg2[%c0, %c0_0, %c0_1] : memref<1x16x16xf32, #tpu.memory_space<vmem>>, vector<1x16x16xf32>
    %1 = vector.shape_cast %0 : vector<1x16x16xf32> to vector<16x16xf32>
    %2 = arith.truncf %1 : vector<16x16xf32> to vector<16x16xbf16>
    %c0_2 = arith.constant 0 : index
    %c0_3 = arith.constant 0 : index
    %c0_4 = arith.constant 0 : index
    %3 = vector.load %arg3[%c0_2, %c0_3, %c0_4] : memref<1x16x128xbf16, #tpu.memory_space<vmem>>, vector<1x16x128xbf16>
    %4 = vector.shape_cast %3 : vector<1x16x128xbf16> to vector<16x128xbf16>
    %cst = arith.constant dense<0.000000e+00> : vector<16x128xf32>
    %5 = tpu.matmul %2, %4, %cst {dimension_numbers = #tpu.dot_dimension_numbers<[1], [0], [0], [1], [0, 0, 1, 1], [], []>} : vector<16x16xbf16>, vector<16x128xbf16>, vector<16x128xf32> -> vector<16x128xf32>
    %cst_5 = arith.constant 0.000000e+00 : f32
    %6 = vector.broadcast %cst_5 : f32 to vector<16x128xf32>
    %7 = arith.maximumf %5, %6 : vector<16x128xf32>
    %c0_6 = arith.constant 0 : index
    %c0_7 = arith.constant 0 : index
    %c0_8 = arith.constant 0 : index
    %8 = vector.load %arg4[%c0_6, %c0_7, %c0_8] : memref<1x16x128xf32, #tpu.memory_space<vmem>>, vector<1x16x128xf32>
    %9 = vector.shape_cast %8 : vector<1x16x128xf32> to vector<16x128xf32>
    %10 = vector.shape_cast %7 : vector<16x128xf32> to vector<1x16x128xf32>
    tpu.vector_store %arg4[%c0_6, %c0_7, %c0_8], %10 {strides = array<i32>} : memref<1x16x128xf32, #tpu.memory_space<vmem>>, vector<1x16x128xf32>,
    return
  }
  func.func @transform_0(%arg0: i32, %arg1: i32) -> (i32, i32, i32) {
    %c0_i32 = arith.constant 0 : i32
    %c0_i32_0 = arith.constant 0 : i32
    return %arg0, %arg1, %c0_i32 : i32, i32, i32
  }
  func.func @transform_1(%arg0: i32, %arg1: i32) -> (i32, i32, i32) {
    %c0_i32 = arith.constant 0 : i32
    %c0_i32_0 = arith.constant 0 : i32
    %c0_i32_1 = arith.constant 0 : i32
    return %arg0, %c0_i32, %c0_i32_0 : i32, i32, i32
  }
  func.func @transform_2(%arg0: i32, %arg1: i32) -> (i32, i32, i32) {
    %c0_i32 = arith.constant 0 : i32
    %c0_i32_0 = arith.constant 0 : i32
    return %arg0, %arg1, %c0_i32 : i32, i32, i32
  }
}

</mosaic_0001>

<bundles_post_ra>
// kernel: tpu_custom_call.1
= control target key start
LH: loop header
LB: loop body
LE: loop exit
PB: predicated region body
PF: predicated region fallthrough
CT: control target
= control target key end

     0   :  { %7 = vsyncpa [#allocation3], 0  ;;  %s916_s0 = inlined_call_operand.hbm [shape: f32[2,16,16], index: 0, kind: input, shape index: {}]   ;;  %s917_s1 = inlined_call_operand.hbm [shape: bf16[2,16,128], index: 1, kind: input, shape index: {}]   ;;  %s918_s2 = inlined_call_operand.hbm [shape: f32[2,16,128], index: 2, kind: output, shape index: {}]  }
   0x1   :  { %9 = vsyncpa [#allocation3 + $0x1], 0 }
   0x2   :  { %10 = vsyncpa [#allocation6], 0 }
   0x3   :  { %12 = vsyncpa [#allocation6 + $0x1], 0 }
   0x4   :  { %13 = vsyncpa [#allocation4], 0 }
   0x5   :  { %15 = vsyncpa [#allocation4 + $0x1], 0  ;;  %s691_s9 = smov 0   ;;  %s693_s10 = smov 0  }
   0x6   :  { %s695_s11 = smov 0   ;;  %s697_s12 = smov 0  }
   0x7   :  { %s699_s13 = smov 0   ;;  %s701_s14 = smov 0  }
   0x8 LB: > { %s409_s15 = sadd.s32 4294967295, %s663_s14   ;;  %s410_s16 = sadd.s32 4294967294, %s663_s14   ;;  %s663_s14 = sphi %s701_s14, %s21_s14   ;;  %s659_s13 = sphi %s699_s13, %s936_s13   ;;  %s655_s12 = sphi %s697_s12, %s935_s12   ;;  %s651_s11 = sphi %s695_s11, %s934_s11   ;;  %s647_s10 = sphi %s693_s10, %s933_s10   ;;  %s643_s9 = sphi %s691_s9, %s932_s9  }
   0x9   : > { %s33_s17 = sadd.s32 1, %s659_s13  ;;  %s42_s18 = sadd.s32 1, %s651_s11 }
   0xa   : > { %p35_p0 = scmp.ge.s32.totalorder %s33_s17, 2  ;;  %p49_p1 = scmp.ne.s32.totalorder %s651_s11, %s647_s10 }
   0xb   : > { %p50_p2 = scmp.eq.s32.totalorder %s663_s14, 0  ;;  %p55_p3 = scmp.ne.s32.totalorder %s647_s10, %s643_s9 }
   0xc   : > { %s938_s17 = smov (%p35_p0, %s33_s17), 0  ;;  %p56_p5 = scmp.eq.s32.totalorder %s409_s15, 0 }
   0xd   : > { %p732_p4 = por %p50_p2, %p49_p1  ;;  %s37_s20 = ssub.s32 %s659_s13, %s938_s17 }
   0xe   : > { %p107_p6 = scmp.eq.s32.totalorder %s409_s15, 1  ;;  %p40_p7 = scmp.eq.s32.totalorder %s37_s20, 0 }
   0xf   : > { %p738_p8 = por %p56_p5, %p55_p3  ;;  %p113_p10 = scmp.eq.s32.totalorder %s410_s16, 1 }
  0x10   : > { %p742_p9 = por %p107_p6, %p49_p1  ;;  %p458_p13 = scmp.lt.s32.totalorder %s663_s14, 2 }
  0x11   : > { %s922_s21 = scalar_select %p738_p8, 1, 0 }
  0x12   : > { %s923_s22 = scalar_select %p742_p9, 1, 0 }
  0x13   : > { %s747_s23 = scalar_select %p40_p7, %s651_s11, %s42_s18  }
  0x14   : > { %p749_p11 = por %p113_p10, %p55_p3  ;;  %s756_s25 = sand.u32 1, %s651_s11  }
  0x15   : > { %s413_s26 = sshll.u32 %s756_s25, 4  ;;  %s430_s27 = sshll.u32 %s659_s13, 8 }
  0x16   : > { %s924_s24 = scalar_select %p749_p11, 1, 0 }
  0x17   : > { %s763_s30 = scalar_lea.hbm %s916_s0, %s430_s27  ;;  %s137_s3 = scalar_lea.vmem [#allocation2], %s413_s26 }
  0x18   : > { %s146_s4 = sshll.u32 %s137_s3, 4  ;;  %p769_p0 = pnand %p458_p13, %p732_p4  ;;  %s765_s4 = int_to_ptr.vmem [resolvable:$true] %s146_s4 }
  0x19   : > { %s134_s6 = scalar_lea.sflag [#allocation3], %s756_s25  ;;  %s517_s7 = scalar_lea.hbm %s763_s30, 256 }
  0x1a   : > { %p518_p2 = scmp.ne.s32.totalorder %s763_s30, %s517_s7  ;;  %p519_p3 = pneg %p769_p0 }
  0x1b   : > { %s522_s16 = scalar_lea.hbm %s916_s0, 512  ;;  %p523_p4 = scmp.lt.u32.totalorder %s763_s30, %s916_s0 }
  0x1c   : > { %p520_p5 = pnand %p519_p3, %p518_p2  ;;  %p524_p7 = scmp.lt.u32.totalorder %s522_s16, %s517_s7 }
  0x1d   : > { %p526_p13 = scmp.lt.u32.totalorder %s517_s7, %s763_s30 }
  0x1e   : > { %p521_p6 = pneg %p520_p5  ;;  %p525_p10 = por %p524_p7, %p523_p4 }
  0x20   : > { %p527_p12 = por %p526_p13, %p525_p10 }
  0x22   : > { %p528_p1 = pnand %p527_p12, %p521_p6 }
  0x24   : > { %531 = shalt.err (!%p528_p1)
}
  0x25   : > { %s532_s20 = scalar_lea.vmem %s765_s4, 256  ;;  %s665_s26 = smov [#allocation2]  }
  0x26   : > { %p533_p2 = scmp.ne.s32.totalorder %s765_s4, %s532_s20  ;;  %s537_s27 = sshll.u32 %s665_s26, 4  ;;  %s538_s27 = int_to_ptr.vmem [resolvable:$false] %s537_s27 }
  0x27   : > { %s539_s28 = scalar_lea.vmem %s538_s27, 512  ;;  %p540_p9 = scmp.lt.s32.totalorder %s765_s4, %s538_s27 }
  0x28   : > { %p535_p5 = pnand %p533_p2, %p519_p3  ;;  %p541_p4 = scmp.lt.s32.totalorder %s539_s28, %s532_s20 }
  0x2a   : > { %p536_p11 = pneg %p535_p5  ;;  %p542_p7 = por %p541_p4, %p540_p9 }
  0x2c   : > { %p543_p10 = pnand %p542_p7, %p536_p11 }
  0x2e   : > { %546 = shalt.err (!%p543_p10)
}
  0x2f   : > { %s666_s29 = smov 128   ;;  %s667_s3 = smov 8  }
  0x30   : > { %450 = dma.hbm_to_vmem [thread:$0]  (!%p769_p0), %s763_s30, 256, %s765_s4, %s134_s6, %s666_s29, %s666_s29, %s667_s3  }
  0x31   : > { %p175_p12 = scmp.lt.s32.totalorder %s663_s14, 3  ;;  %s416_s7 = sshll.u32 %s756_s25, 3 }
  0x32   : > { %s431_s8 = sshll.u32 %s659_s13, 7  ;;  %p926_p9 = scmp.ge.s32.totalorder %s663_s14, 1 }
  0x33   : > { %s814_s19 = scalar_lea.hbm %s917_s1, %s431_s8  ;;  %s160_s20 = scalar_lea.vmem [#allocation5], %s416_s7 }
  0x34   : > { %p807_p11 = pnand %p926_p9, %p175_p12  ;;  %s167_s26 = sshll.u32 %s160_s20, 4  ;;  %s816_s26 = int_to_ptr.vmem [resolvable:$true] %s167_s26 }
  0x35   : > { %s157_s30 = scalar_lea.sflag [#allocation6], %s756_s25  ;;  %s547_s4 = scalar_lea.hbm %s814_s19, 128 }
  0x36   : > { %p548_p1 = scmp.ne.s32.totalorder %s814_s19, %s547_s4  ;;  %s552_s28 = scalar_lea.hbm %s917_s1, 256 }
  0x37   : > { %p553_p2 = scmp.lt.u32.totalorder %s814_s19, %s917_s1  ;;  %p554_p5 = scmp.lt.u32.totalorder %s552_s28, %s547_s4 }
  0x38   : > { %p550_p6 = pnand %p548_p1, %p519_p3  ;;  %p556_p7 = scmp.lt.u32.totalorder %s547_s4, %s814_s19 }
  0x39   : > { %p555_p4 = por %p554_p5, %p553_p2 }
  0x3a   : > { %p551_p13 = pneg %p550_p6 }
  0x3b   : > { %p557_p10 = por %p556_p7, %p555_p4 }
  0x3d   : > { %p558_p12 = pnand %p557_p10, %p551_p13 }
  0x3f   : > { %561 = shalt.err (!%p558_p12)
}
  0x40   : > { %s562_s7 = scalar_lea.vmem %s816_s26, 128  ;;  %s668_s8 = smov [#allocation5]  }
  0x41   : > { %p563_p9 = scmp.ne.s32.totalorder %s816_s26, %s562_s7  ;;  %s567_s16 = sshll.u32 %s668_s8, 4  ;;  %s568_s16 = int_to_ptr.vmem [resolvable:$false] %s567_s16 }
  0x42   : > { %s569_s18 = scalar_lea.vmem %s568_s16, 256  ;;  %p570_p8 = scmp.lt.s32.totalorder %s816_s26, %s568_s16 }
  0x43   : > { %p565_p1 = pnand %p563_p9, %p519_p3  ;;  %p571_p2 = scmp.lt.s32.totalorder %s569_s18, %s562_s7 }
  0x45   : > { %p566_p6 = pneg %p565_p1  ;;  %p572_p5 = por %p571_p2, %p570_p8 }
  0x47   : > { %p573_p4 = pnand %p572_p5, %p566_p6 }
  0x49   : > { %576 = shalt.err (!%p573_p4)
}
  0x4a   : > { %s669_s20 = smov 64   ;;  %s670_s4 = smov 4  }
  0x4b   : > { %453 = dma.hbm_to_vmem [thread:$0]  (!%p769_p0), %s814_s19, 128, %s816_s26, %s157_s30, %s669_s20, %s669_s20, %s670_s4  }
  0x4c   : > { %179 = sbr.rel (%p807_p11) target bundleno = 323 (0x143), region = 28  ;;  %s847_s6 = sand.u32 (!%p807_p11), 1, %s647_s10  }
  0x4d   : > { %s420_s27 = sshll.u32 (!%p807_p11), %s847_s6, 4  ;;  %s182_s28 = scalar_lea.sflag (!%p807_p11), [#allocation3], %s847_s6 }
  0x4e   : > { %s185_s29 = scalar_lea.vmem (!%p807_p11), [#allocation2], %s420_s27  ;;  %p928_p8 = scmp.ne.s32.totalorder (!%p807_p11), %s922_s21, 0 }
  0x53   : > { %630 = dma.done.wait (%p928_p8), %s182_s28, 256  }
  0x54   : > { %632 = vsyncadd (%p928_p8), %s182_s28, 4294967040  ;;  %s421_s25 = sshll.u32 %s847_s6, 3  ;;  %s191_s5 = scalar_lea.sflag [#allocation6], %s847_s6 }
  0x55   : > { %s194_s15 = scalar_lea.vmem [#allocation5], %s421_s25 }
  0x56   : > { %634 = dma.done.wait (%p928_p8), %s191_s5, 128  }
  0x57   : > { %636 = vsyncadd (%p928_p8), %s191_s5, 4294967168  ;;  %v671_v0 = vmov 0.0   ;;  %vm672_vm0 = vmmov 0   ;;  %v516_v1 = vld [vmem:[%s194_s15] sm:$0xff]   ;;  %v224_v3 = vld [vmem:[%s185_s29 + $0x8] sm:$0xff]  ;;  %vm234_vm1 = vcmask 130048  }
  0x58   : > { %435 = vmatprep.subr.bf16.mxu0 %v671_v0  ;;  %437 = vmatprep.mubr.msk.bf16.mxu0 %vm672_vm0, %v671_v0  ;;  %v223_v2 = vld [vmem:[%s185_s29] sm:$0xff]  ;;  %s219_s19 = scalar_lea.vmem [#allocation7], %s420_s27  ;;  %s432_s30 = sshll.u32 %s655_s12, 8 }
  0x59   : > { %436 = vmatpush3.bf16.msra.mxu0 %v516_v1  ;;  %v225_v4 = vpack.c.bf16 %v224_v3, %v223_v2  ;;  %s299_s26 = sshll.u32 %s219_s19, 4  ;;  %s867_s7 = scalar_lea.hbm %s918_s2, %s432_s30  ;;  %s862_s26 = int_to_ptr.vmem [resolvable:$true] %s299_s26 }
  0x5a   : > { %s284_s8 = scalar_lea.sflag [#allocation4], %s847_s6  ;;  %s577_s12 = scalar_lea.vmem %s862_s26, 256 }
  0x5b   : > { %p578_p0 = scmp.ne.s32.totalorder %s862_s26, %s577_s12  ;;  %p929_p3 = scmp.ne.s32.totalorder %s923_s22, 0 }
  0x5c   : > { %438 = vmatmul.mubr.msk.bf16.vlgmr.msra.gmra.mrb[0].mxu0 %vm234_vm1, %v225_v4  ;;  %s673_s16 = smov [#allocation7]  }
  0x5d   : > { %p579_p11 = pnand %p578_p0, %p929_p3  ;;  %s581_s18 = sshll.u32 %s673_s16, 4  ;;  %s582_s18 = int_to_ptr.vmem [resolvable:$false] %s581_s18 }
  0x5e   : > { %s583_s20 = scalar_lea.vmem %s582_s18, 512  ;;  %p584_p7 = scmp.lt.s32.totalorder %s862_s26, %s582_s18 }
  0x5f   : > { %p580_p13 = pneg %p579_p11  ;;  %p585_p10 = scmp.lt.s32.totalorder %s583_s20, %s577_s12 }
  0x61   : > { %p586_p12 = por %p585_p10, %p584_p7 }
  0x63   : > { %p587_p9 = pnand %p586_p12, %p580_p13 }
 0x12f   : > { %v272_v5 = vpop.f32.mrb[0].mxu0 }
 0x130   : > { %v279_v6 = vmax.f32 %v272_v5, 0.0  ;;  %v439_v7 = vpop.f32.mrb[1].mxu0 }
 0x131   : > { %v275_v8 = vpop.f32.mrb[2].mxu0 }
 0x132   : > { %281 = vst [vmem:[%s219_s19] sm:$0xff] %v279_v6  ;;  %v280_v9 = vmax.f32 %v275_v8, 0.0  ;;  %v440_v10 = vpop.f32.mrb[3].mxu0 }
 0x134   : > { %282 = vst [vmem:[%s219_s19 + $0x8] sm:$0xff] %v280_v9 }
 0x135   : > { %590 = shalt.err (!%p587_p9)
}
 0x136   : > { %s591_s4 = scalar_lea.hbm %s867_s7, 256  ;;  %s595_s29 = scalar_lea.hbm %s918_s2, 512 }
 0x137   : > { %p592_p1 = scmp.ne.s32.totalorder %s867_s7, %s591_s4  ;;  %p596_p5 = scmp.lt.u32.totalorder %s867_s7, %s918_s2 }
 0x138   : > { %p597_p4 = scmp.lt.u32.totalorder %s595_s29, %s591_s4  ;;  %p599_p0 = scmp.lt.u32.totalorder %s591_s4, %s867_s7 }
 0x139   : > { %p593_p6 = pnand %p592_p1, %p929_p3 }
 0x13a   : > { %p598_p8 = por %p597_p4, %p596_p5 }
 0x13b   : > { %p594_p2 = pneg %p593_p6 }
 0x13c   : > { %p600_p11 = por %p599_p0, %p598_p8 }
 0x13e   : > { %p601_p13 = pnand %p600_p11, %p594_p2 }
 0x140   : > { %604 = shalt.err (!%p601_p13)
}
 0x141   : > { %s674_s15 = smov 128   ;;  %s675_s19 = smov 8  }
 0x142   : > { %445 = dma.vmem_to_hbm [thread:$0]  (%p929_p3), %s862_s26, 256, %s867_s7, %s284_s8, %s674_s15, %s674_s15, %s675_s19  }
 0x143 PF: > { %s314_s30 = sand.u32 1, %s643_s9   ;;  %p930_p7 = scmp.ne.s32.totalorder %s924_s24, 0 }
 0x144   : > { %p931_p10 = scmp.ge.s32.totalorder %s663_s14, 2  ;;  %s315_s21 = scalar_lea.sflag [#allocation4], %s314_s30 }
 0x146   : > { %p455_p12 = pnand %p931_p10, %p930_p7 }
 0x148   : > { %638 = dma.done.wait (!%p455_p12), %s315_s21, 256  }
 0x149   : > { %640 = vsyncadd (!%p455_p12), %s315_s21, 4294967040  ;;  %s21_s14 = sadd.s32 1, %s663_s14   ;;  %s932_s9 = smov %s647_s10 }
 0x14a   : > { %p18_p9 = scmp.ge.s32.totalorder %s21_s14, 4   ;;  %s933_s10 = smov %s651_s11 }
 0x14b   : > { %s934_s11 = smov %s747_s23  ;;  %s935_s12 = smov %s659_s13 }
 0x14c   : > { %s936_s13 = smov %s938_s17  ;;  %20 = sbr.rel (!%p18_p9) target bundleno = 8 (0x8), region = 86 }
 0x153   :  { %320 = vsyncpa [#allocation3], 1 }
 0x154   :  { %322 = vsyncpa [#allocation3 + $0x1], 1 }
 0x155   :  { %323 = vsyncpa [#allocation6], 1 }
 0x156   :  { %325 = vsyncpa [#allocation6 + $0x1], 1 }
 0x157   :  { %326 = vsyncpa [#allocation4], 1 }
 0x158   :  { %328 = vsyncpa [#allocation4 + $0x1], 1 }

</bundles_post_ra>
